<compile_context>
chip_gen: v6e
topology: v6e:2x2x1
jax: 0.10.0
libtpu: 0.0.40
codegen_flags: <defaults>
</compile_context>

<pallas_src>
import math
import functools

import jax
import jax.numpy as jnp
from jax.experimental import pallas as pl
from jax.experimental.pallas import tpu as pltpu

PI = math.pi


def _round_up(x, m):
    return ((x + m - 1) // m) * m


def update_e_kernel(idx_ref, dist_ref, emb_ref, vlin_ref,
                    w1_ref, b1_ref, w2_ref, b2_ref, w3_ref, b3_ref,
                    loutw_ref, loutb_ref, out_ref, *, cutoff, fold):
    f32 = jnp.float32
    bf16 = jnp.bfloat16

    idx = idx_ref[...]                                  # [tr, fold] int32
    dist = dist_ref[...]                                # [tr, fold] f32
    emb = emb_ref[...]                                  # [tr, fold*G] f32
    tr = emb.shape[0]
    n_pad = vlin_ref.shape[0]

    # --- filter MLP on the gaussian expansion (block-diagonal packed weights)
    #     Linear -> LeakyReLU(0.015) -> Linear -> LeakyReLU(0.015) -> Linear
    h = jnp.dot(emb.astype(bf16), w1_ref[...],
                preferred_element_type=f32) + b1_ref[...]
    h = jnp.maximum(h, 0.015 * h)                       # LeakyReLU(0.015)
    h = jnp.dot(h.astype(bf16), w2_ref[...],
                preferred_element_type=f32) + b2_ref[...]
    h = jnp.maximum(h, 0.015 * h)
    W = jnp.dot(h.astype(bf16), w3_ref[...],
                preferred_element_type=f32) + b3_ref[...]   # [tr, fold*F]

    # --- cosine cutoff per edge (fold edges per packed row)
    C = 0.5 * (jnp.cos(dist * (PI / cutoff)) + 1.0)     # [tr, fold] f32

    # --- fused gather of lin(v)[j], pre-scaled by C, via one-hot MXU matmuls.
    #     The one-hot's single nonzero per row carries C, so the result is
    #     C * v_lin[j] directly (no lane-expansion of C needed).
    vlin = vlin_ref[...]                                # [n_pad, F] bf16
    node_iota = jax.lax.broadcasted_iota(jnp.int32, (tr, n_pad), 1)
    parts = []
    for f in range(fold):
        sel = jnp.where(idx[:, f:f + 1] == node_iota, C[:, f:f + 1], 0.0)
        parts.append(jnp.dot(sel.astype(bf16), vlin,
                             preferred_element_type=f32))     # [tr, F]
    vjC = jnp.concatenate(parts, axis=1) if fold > 1 else parts[0]  # [tr, fold*F]

    # --- e = lin(v)[j] * (W * C) ;  out = lin_out(e) + e
    e = vjC * W
    out = jnp.dot(e.astype(bf16), loutw_ref[...],
                  preferred_element_type=f32) + loutb_ref[...] + e
    out_ref[...] = out.astype(out_ref.dtype)


def update_e(v, dist, dist_emb, edge_index, params, *, cutoff, te=8192, fold=None):
    """Pallas implementation of UpdateE.forward."""
    E = dist.shape[0]
    N = v.shape[0]
    G = dist_emb.shape[1]
    F = params["w1"].shape[1]

    # Lane-packing factor: pack `fold` edges per 128-lane row (4 for F=32).
    # Pass fold=8 on v6e/v7x to match the 256-wide MXU.
    if fold is None:
        fold = 128 // F if (F <= 128 and 128 % F == 0) else 1
    PF = F * fold

    # lin commutes with the row gather: apply on nodes, keep resident in VMEM.
    v_lin = jnp.dot(v, params["lin_w"])                      # [N, F] f32
    n_pad = max(8, _round_up(N, 8))
    if n_pad != N:
        v_lin = jnp.pad(v_lin, ((0, n_pad - N), (0, 0)))
    v_lin = v_lin.astype(jnp.bfloat16)

    # Edge tile (counted in edges): multiple of 8*fold, no larger than the
    # rounded-up edge count, and capped so the grid keeps >= 2 steps when the
    # problem allows it (v7x has two TensorCores on the "parallel" axis).
    align = 8 * fold
    te = min(int(te), _round_up(max(E, 1), align))
    te = min(te, max(align, _round_up(pl.cdiv(max(E, 1), 2), align)))
    te = max(align, (te // align) * align)
    E_pad = _round_up(max(E, 1), te)

    # Pad only the small per-edge streams (indices / dist / dist_emb).
    idx = edge_index[0].astype(jnp.int32)
    d = dist.astype(jnp.float32).reshape(E)
    emb = dist_emb.astype(jnp.float32)
    if E_pad != E:
        pad = E_pad - E
        idx = jnp.pad(idx, (0, pad))
        d = jnp.pad(d, (0, pad))
        emb = jnp.pad(emb, ((0, pad), (0, 0)))

    rows = E_pad // fold
    tr = te // fold
    idx = idx.reshape(rows, fold)
    d = d.reshape(rows, fold)
    emb = emb.reshape(rows, G * fold)

    # Block-diagonal bf16 weights (fold copies on the diagonal), tiled f32 biases.
    eye = jnp.eye(fold, dtype=jnp.float32)
    bd = lambda w: jnp.kron(eye, w).astype(jnp.bfloat16)
    tb = lambda b: jnp.tile(b.reshape(1, F), (1, fold)).astype(jnp.float32)
    w1, w2, w3 = bd(params["w1"]), bd(params["w2"]), bd(params["w3"])
    loutw = bd(params["lout_w"])
    b1, b2, b3 = tb(params["b1"]), tb(params["b2"]), tb(params["b3"])
    loutb = tb(params["lout_b"])

    edge_spec = lambda c: pl.BlockSpec((tr, c), lambda i: (i, 0))
    const_spec = lambda r, c: pl.BlockSpec((r, c), lambda i: (0, 0))

    kernel = functools.partial(update_e_kernel, cutoff=float(cutoff), fold=fold)

    # Scheduling hint for XLA around the custom call.
    flops = 2 * E_pad * (fold * F * (G + 3 * F) + n_pad * F)
    bytes_accessed = ((idx.size + d.size + emb.size) * 4 + v_lin.size * 2
                      + E_pad * F * 4
                      + (w1.size + w2.size + w3.size + loutw.size) * 2
                      + (b1.size + b2.size + b3.size + loutb.size) * 4)
    cost = pl.CostEstimate(flops=int(flops), transcendentals=int(E_pad),
                           bytes_accessed=int(bytes_accessed))

    # Per-step VMEM: double-buffered edge streams + output + resident constants.
    per_step = 2 * (tr * fold * 8 + tr * G * fold * 4 + tr * PF * 4)
    const_bytes = n_pad * F * 2 + (G * fold * PF + 3 * PF * PF) * 2 + 4 * PF * 4
    cparams = dict(dimension_semantics=("parallel",))
    if per_step + const_bytes > 12 * 1024 * 1024:
        cparams["vmem_limit_bytes"] = min(per_step + const_bytes + (16 << 20),
                                          100 << 20)

    out = pl.pallas_call(
        kernel,
        out_shape=jax.ShapeDtypeStruct((rows, PF), jnp.float32),
        grid_spec=pltpu.PrefetchScalarGridSpec(
            num_scalar_prefetch=0,
            grid=(rows // tr,),
            in_specs=[
                edge_spec(fold),          # packed source node indices (int32)
                edge_spec(fold),          # packed dist
                edge_spec(G * fold),      # packed gaussian embedding
                const_spec(n_pad, F),     # lin(v), VMEM-resident (bf16)
                const_spec(G * fold, PF),  # mlp W1 block-diag (bf16)
                const_spec(1, PF),         # mlp b1
                const_spec(PF, PF),        # mlp W2 block-diag (bf16)
                const_spec(1, PF),         # mlp b2
                const_spec(PF, PF),        # mlp W3 block-diag (bf16)
                const_spec(1, PF),         # mlp b3
                const_spec(PF, PF),        # lin_out W block-diag (bf16)
                const_spec(1, PF),         # lin_out b
            ],
            out_specs=pl.BlockSpec((tr, PF), lambda i: (i, 0)),
        ),
        compiler_params=pltpu.CompilerParams(**cparams),
        cost_estimate=cost,
    )(idx, d, emb, v_lin, w1, b1, w2, b2, w3, b3, loutw, loutb)

    # Unpack lanes back to [E, F] (contiguous reshape) and trim edge padding.
    return out.reshape(E_pad, F)[:E]


def xavier_uniform(key, fan_in, fan_out):
    bound = math.sqrt(6.0 / (fan_in + fan_out))
    # Stored as [in, out] so the kernel does x @ W (equivalent to torch x @ W.T).
    return jax.random.uniform(key, (fan_in, fan_out), jnp.float32, -bound, bound)


def reference_update_e_f32(v, dist, dist_emb, edge_index, params, cutoff):
    j = edge_index[0]
    C = 0.5 * (jnp.cos(dist * PI / cutoff) + 1.0)
    h = dist_emb @ params["w1"] + params["b1"]
    h = jnp.where(h >= 0, h, 0.015 * h)
    h = h @ params["w2"] + params["b2"]
    h = jnp.where(h >= 0, h, 0.015 * h)
    W = (h @ params["w3"] + params["b3"]) * C[:, None]
    v_lin = v @ params["lin_w"]
    e = v_lin[j] * W
    return e @ params["lout_w"] + params["lout_b"] + e


def reference_update_e_bf16(v, dist, dist_emb, edge_index, params, cutoff):
    # Mirrors the kernel's bf16 MXU feeds / bf16 gather / f32 accumulation.
    bf16 = jnp.bfloat16
    bdot = lambda a, w: jnp.dot(a.astype(bf16), w.astype(bf16),
                                preferred_element_type=jnp.float32)
    j = edge_index[0]
    C = 0.5 * (jnp.cos(dist * PI / cutoff) + 1.0)
    h = bdot(dist_emb, params["w1"]) + params["b1"]
    h = jnp.maximum(h, 0.015 * h)
    h = bdot(h, params["w2"]) + params["b2"]
    h = jnp.maximum(h, 0.015 * h)
    W = bdot(h, params["w3"]) + params["b3"]
    v_lin = (v @ params["lin_w"]).astype(bf16).astype(jnp.float32)
    Cb = C.astype(bf16).astype(jnp.float32)
    e = (Cb[:, None] * v_lin[j]) * W
    return bdot(e, params["lout_w"]) + params["lout_b"] + e


if __name__ == "__main__":
    hidden_channels = 32
    num_filters = 32
    num_gaussians = 16
    cutoff = 5.0

    num_nodes = 10
    num_edges = 64

    key = jax.random.PRNGKey(0)
    keys = jax.random.split(key, 10)

    params = {
        "lin_w": xavier_uniform(keys[0], hidden_channels, num_filters),
        "w1": xavier_uniform(keys[1], num_gaussians, num_filters),
        "b1": jnp.zeros((1, num_filters), jnp.float32),
        "w2": xavier_uniform(keys[2], num_filters, num_filters),
        "b2": jnp.zeros((1, num_filters), jnp.float32),
        "w3": xavier_uniform(keys[3], num_filters, num_filters),
        "b3": jnp.zeros((1, num_filters), jnp.float32),
        "lout_w": xavier_uniform(keys[4], num_filters, num_filters),
        "lout_b": jnp.zeros((1, num_filters), jnp.float32),
    }

    v = jax.random.normal(keys[5], (num_nodes, hidden_channels), jnp.float32)
    dist = jax.random.uniform(keys[6], (num_edges,), jnp.float32, 0.1, cutoff)
    dist_emb = jax.random.normal(keys[7], (num_edges, num_gaussians), jnp.float32)
    edge_index = jax.random.randint(keys[8], (2, num_edges), 0, num_nodes, jnp.int32)

    out = update_e(v, dist, dist_emb, edge_index, params, cutoff=cutoff)
    out = jax.block_until_ready(out)
    assert out.shape == (num_edges, num_filters)

    ref_bf16 = reference_update_e_bf16(v, dist, dist_emb, edge_index, params, cutoff)
    ref_f32 = reference_update_e_f32(v, dist, dist_emb, edge_index, params, cutoff)
    assert jnp.allclose(out, ref_bf16, atol=2e-3, rtol=2e-3), \
        "mismatch vs bf16-emulating reference"
    assert jnp.allclose(out, ref_f32, atol=1e-1, rtol=1e-1), \
        "mismatch vs f32 reference"

    print("KERNEL_OK")
</pallas_src>

<mosaic_0001>
module attributes {stable_mosaic.version = 11 : i64} {
  func.func @update_e_kernel(%arg0: i32, %arg1: memref<8x4xi32, #tpu.memory_space<vmem>>, %arg2: memref<8x4xf32, #tpu.memory_space<vmem>>, %arg3: memref<8x64xf32, #tpu.memory_space<vmem>>, %arg4: memref<16x32xbf16, #tpu.memory_space<vmem>>, %arg5: memref<64x128xbf16, #tpu.memory_space<vmem>>, %arg6: memref<1x128xf32, #tpu.memory_space<vmem>>, %arg7: memref<128x128xbf16, #tpu.memory_space<vmem>>, %arg8: memref<1x128xf32, #tpu.memory_space<vmem>>, %arg9: memref<128x128xbf16, #tpu.memory_space<vmem>>, %arg10: memref<1x128xf32, #tpu.memory_space<vmem>>, %arg11: memref<128x128xbf16, #tpu.memory_space<vmem>>, %arg12: memref<1x128xf32, #tpu.memory_space<vmem>>, %arg13: memref<8x128xf32, #tpu.memory_space<vmem>>) attributes {dimension_semantics = [#tpu.dimension_semantics<parallel>], iteration_bounds = array<i64: 2>, scalar_prefetch = 0 : i64, scratch_operands = 0 : i64, tpu.core_type = #tpu.core_type<tc>, window_params = [{transform_indices = @transform_0, window_bounds = array<i64: 8, 4>}, {transform_indices = @transform_1, window_bounds = array<i64: 8, 4>}, {transform_indices = @transform_2, window_bounds = array<i64: 8, 64>}, {pipeline_mode = #tpu.pipeline_mode<synchronous>, transform_indices = @transform_3, window_bounds = array<i64: 16, 32>}, {pipeline_mode = #tpu.pipeline_mode<synchronous>, transform_indices = @transform_4, window_bounds = array<i64: 64, 128>}, {pipeline_mode = #tpu.pipeline_mode<synchronous>, transform_indices = @transform_5, window_bounds = array<i64: 1, 128>}, {pipeline_mode = #tpu.pipeline_mode<synchronous>, transform_indices = @transform_6, window_bounds = array<i64: 128, 128>}, {pipeline_mode = #tpu.pipeline_mode<synchronous>, transform_indices = @transform_7, window_bounds = array<i64: 1, 128>}, {pipeline_mode = #tpu.pipeline_mode<synchronous>, transform_indices = @transform_8, window_bounds = array<i64: 128, 128>}, {pipeline_mode = #tpu.pipeline_mode<synchronous>, transform_indices = @transform_9, window_bounds = array<i64: 1, 128>}, {pipeline_mode = #tpu.pipeline_mode<synchronous>, transform_indices = @transform_10, window_bounds = array<i64: 128, 128>}, {pipeline_mode = #tpu.pipeline_mode<synchronous>, transform_indices = @transform_11, window_bounds = array<i64: 1, 128>}, {transform_indices = @transform_12, window_bounds = array<i64: 8, 128>}]} {
    %c0 = arith.constant 0 : index
    %c0_0 = arith.constant 0 : index
    %0 = vector.load %arg1[%c0, %c0_0] : memref<8x4xi32, #tpu.memory_space<vmem>>, vector<8x4xi32>
    %c0_1 = arith.constant 0 : index
    %c0_2 = arith.constant 0 : index
    %1 = vector.load %arg2[%c0_1, %c0_2] : memref<8x4xf32, #tpu.memory_space<vmem>>, vector<8x4xf32>
    %c0_3 = arith.constant 0 : index
    %c0_4 = arith.constant 0 : index
    %2 = vector.load %arg3[%c0_3, %c0_4] : memref<8x64xf32, #tpu.memory_space<vmem>>, vector<8x64xf32>
    %3 = arith.truncf %2 : vector<8x64xf32> to vector<8x64xbf16>
    %c0_5 = arith.constant 0 : index
    %c0_6 = arith.constant 0 : index
    %4 = vector.load %arg5[%c0_5, %c0_6] : memref<64x128xbf16, #tpu.memory_space<vmem>>, vector<64x128xbf16>
    %cst = arith.constant dense<0.000000e+00> : vector<8x128xf32>
    %5 = tpu.matmul %3, %4, %cst {dimension_numbers = #tpu.dot_dimension_numbers<[1], [0], [0], [1], [0, 0, 1, 1], [], []>} : vector<8x64xbf16>, vector<64x128xbf16>, vector<8x128xf32> -> vector<8x128xf32>
    %c0_7 = arith.constant 0 : index
    %c0_8 = arith.constant 0 : index
    %6 = vector.load %arg6[%c0_7, %c0_8] : memref<1x128xf32, #tpu.memory_space<vmem>>, vector<1x128xf32>
    %7 = vector.broadcast %6 : vector<1x128xf32> to vector<8x128xf32>
    %8 = arith.addf %5, %7 : vector<8x128xf32>
    %cst_9 = arith.constant 1.500000e-02 : f32
    %9 = vector.broadcast %cst_9 : f32 to vector<8x128xf32>
    %10 = arith.mulf %9, %8 : vector<8x128xf32>
    %11 = arith.maximumf %8, %10 : vector<8x128xf32>
    %12 = arith.truncf %11 : vector<8x128xf32> to vector<8x128xbf16>
    %c0_10 = arith.constant 0 : index
    %c0_11 = arith.constant 0 : index
    %13 = vector.load %arg7[%c0_10, %c0_11] : memref<128x128xbf16, #tpu.memory_space<vmem>>, vector<128x128xbf16>
    %cst_12 = arith.constant dense<0.000000e+00> : vector<8x128xf32>
    %14 = tpu.matmul %12, %13, %cst_12 {dimension_numbers = #tpu.dot_dimension_numbers<[1], [0], [0], [1], [0, 0, 1, 1], [], []>} : vector<8x128xbf16>, vector<128x128xbf16>, vector<8x128xf32> -> vector<8x128xf32>
    %c0_13 = arith.constant 0 : index
    %c0_14 = arith.constant 0 : index
    %15 = vector.load %arg8[%c0_13, %c0_14] : memref<1x128xf32, #tpu.memory_space<vmem>>, vector<1x128xf32>
    %16 = vector.broadcast %15 : vector<1x128xf32> to vector<8x128xf32>
    %17 = arith.addf %14, %16 : vector<8x128xf32>
    %cst_15 = arith.constant 1.500000e-02 : f32
    %18 = vector.broadcast %cst_15 : f32 to vector<8x128xf32>
    %19 = arith.mulf %18, %17 : vector<8x128xf32>
    %20 = arith.maximumf %17, %19 : vector<8x128xf32>
    %21 = arith.truncf %20 : vector<8x128xf32> to vector<8x128xbf16>
    %c0_16 = arith.constant 0 : index
    %c0_17 = arith.constant 0 : index
    %22 = vector.load %arg9[%c0_16, %c0_17] : memref<128x128xbf16, #tpu.memory_space<vmem>>, vector<128x128xbf16>
    %cst_18 = arith.constant dense<0.000000e+00> : vector<8x128xf32>
    %23 = tpu.matmul %21, %22, %cst_18 {dimension_numbers = #tpu.dot_dimension_numbers<[1], [0], [0], [1], [0, 0, 1, 1], [], []>} : vector<8x128xbf16>, vector<128x128xbf16>, vector<8x128xf32> -> vector<8x128xf32>
    %c0_19 = arith.constant 0 : index
    %c0_20 = arith.constant 0 : index
    %24 = vector.load %arg10[%c0_19, %c0_20] : memref<1x128xf32, #tpu.memory_space<vmem>>, vector<1x128xf32>
    %25 = vector.broadcast %24 : vector<1x128xf32> to vector<8x128xf32>
    %26 = arith.addf %23, %25 : vector<8x128xf32>
    %cst_21 = arith.constant 0.628318548 : f32
    %27 = vector.broadcast %cst_21 : f32 to vector<8x4xf32>
    %28 = arith.mulf %1, %27 : vector<8x4xf32>
    %29 = math.cos %28 : vector<8x4xf32>
    %cst_22 = arith.constant 1.000000e+00 : f32
    %30 = vector.broadcast %cst_22 : f32 to vector<8x4xf32>
    %31 = arith.addf %29, %30 : vector<8x4xf32>
    %cst_23 = arith.constant 5.000000e-01 : f32
    %32 = vector.broadcast %cst_23 : f32 to vector<8x4xf32>
    %33 = arith.mulf %32, %31 : vector<8x4xf32>
    %c0_24 = arith.constant 0 : index
    %c0_25 = arith.constant 0 : index
    %34 = vector.load %arg4[%c0_24, %c0_25] : memref<16x32xbf16, #tpu.memory_space<vmem>>, vector<16x32xbf16>
    %35 = tpu.iota {dimensions = array<i32: 1>} : vector<8x16xi32>
    %36 = vector.extract_strided_slice %0 {offsets = [0, 0], sizes = [8, 1], strides = [1, 1]} : vector<8x4xi32> to vector<8x1xi32>
    %37 = vector.broadcast %36 : vector<8x1xi32> to vector<8x16xi32>
    %38 = arith.cmpi eq, %37, %35 : vector<8x16xi32>
    %39 = vector.extract_strided_slice %33 {offsets = [0, 0], sizes = [8, 1], strides = [1, 1]} : vector<8x4xf32> to vector<8x1xf32>
    %cst_26 = arith.constant 0.000000e+00 : f32
    %40 = vector.shape_cast %39 : vector<8x1xf32> to vector<8x1xf32>
    %41 = vector.broadcast %40 : vector<8x1xf32> to vector<8x16xf32>
    %42 = vector.broadcast %cst_26 : f32 to vector<8x16xf32>
    %43 = arith.select %38, %41, %42 : vector<8x16xi1>, vector<8x16xf32>
    %44 = arith.truncf %43 : vector<8x16xf32> to vector<8x16xbf16>
    %cst_27 = arith.constant dense<0.000000e+00> : vector<8x32xf32>
    %45 = tpu.matmul %44, %34, %cst_27 {dimension_numbers = #tpu.dot_dimension_numbers<[1], [0], [0], [1], [0, 0, 1, 1], [], []>} : vector<8x16xbf16>, vector<16x32xbf16>, vector<8x32xf32> -> vector<8x32xf32>
    %46 = vector.extract_strided_slice %0 {offsets = [0, 1], sizes = [8, 1], strides = [1, 1]} : vector<8x4xi32> to vector<8x1xi32>
    %47 = vector.broadcast %46 : vector<8x1xi32> to vector<8x16xi32>
    %48 = arith.cmpi eq, %47, %35 : vector<8x16xi32>
    %49 = vector.extract_strided_slice %33 {offsets = [0, 1], sizes = [8, 1], strides = [1, 1]} : vector<8x4xf32> to vector<8x1xf32>
    %cst_28 = arith.constant 0.000000e+00 : f32
    %50 = vector.shape_cast %49 : vector<8x1xf32> to vector<8x1xf32>
    %51 = vector.broadcast %50 : vector<8x1xf32> to vector<8x16xf32>
    %52 = vector.broadcast %cst_28 : f32 to vector<8x16xf32>
    %53 = arith.select %48, %51, %52 : vector<8x16xi1>, vector<8x16xf32>
    %54 = arith.truncf %53 : vector<8x16xf32> to vector<8x16xbf16>
    %cst_29 = arith.constant dense<0.000000e+00> : vector<8x32xf32>
    %55 = tpu.matmul %54, %34, %cst_29 {dimension_numbers = #tpu.dot_dimension_numbers<[1], [0], [0], [1], [0, 0, 1, 1], [], []>} : vector<8x16xbf16>, vector<16x32xbf16>, vector<8x32xf32> -> vector<8x32xf32>
    %56 = vector.extract_strided_slice %0 {offsets = [0, 2], sizes = [8, 1], strides = [1, 1]} : vector<8x4xi32> to vector<8x1xi32>
    %57 = vector.broadcast %56 : vector<8x1xi32> to vector<8x16xi32>
    %58 = arith.cmpi eq, %57, %35 : vector<8x16xi32>
    %59 = vector.extract_strided_slice %33 {offsets = [0, 2], sizes = [8, 1], strides = [1, 1]} : vector<8x4xf32> to vector<8x1xf32>
    %cst_30 = arith.constant 0.000000e+00 : f32
    %60 = vector.shape_cast %59 : vector<8x1xf32> to vector<8x1xf32>
    %61 = vector.broadcast %60 : vector<8x1xf32> to vector<8x16xf32>
    %62 = vector.broadcast %cst_30 : f32 to vector<8x16xf32>
    %63 = arith.select %58, %61, %62 : vector<8x16xi1>, vector<8x16xf32>
    %64 = arith.truncf %63 : vector<8x16xf32> to vector<8x16xbf16>
    %cst_31 = arith.constant dense<0.000000e+00> : vector<8x32xf32>
    %65 = tpu.matmul %64, %34, %cst_31 {dimension_numbers = #tpu.dot_dimension_numbers<[1], [0], [0], [1], [0, 0, 1, 1], [], []>} : vector<8x16xbf16>, vector<16x32xbf16>, vector<8x32xf32> -> vector<8x32xf32>
    %66 = vector.extract_strided_slice %0 {offsets = [0, 3], sizes = [8, 1], strides = [1, 1]} : vector<8x4xi32> to vector<8x1xi32>
    %67 = vector.broadcast %66 : vector<8x1xi32> to vector<8x16xi32>
    %68 = arith.cmpi eq, %67, %35 : vector<8x16xi32>
    %69 = vector.extract_strided_slice %33 {offsets = [0, 3], sizes = [8, 1], strides = [1, 1]} : vector<8x4xf32> to vector<8x1xf32>
    %cst_32 = arith.constant 0.000000e+00 : f32
    %70 = vector.shape_cast %69 : vector<8x1xf32> to vector<8x1xf32>
    %71 = vector.broadcast %70 : vector<8x1xf32> to vector<8x16xf32>
    %72 = vector.broadcast %cst_32 : f32 to vector<8x16xf32>
    %73 = arith.select %68, %71, %72 : vector<8x16xi1>, vector<8x16xf32>
    %74 = arith.truncf %73 : vector<8x16xf32> to vector<8x16xbf16>
    %cst_33 = arith.constant dense<0.000000e+00> : vector<8x32xf32>
    %75 = tpu.matmul %74, %34, %cst_33 {dimension_numbers = #tpu.dot_dimension_numbers<[1], [0], [0], [1], [0, 0, 1, 1], [], []>} : vector<8x16xbf16>, vector<16x32xbf16>, vector<8x32xf32> -> vector<8x32xf32>
    %76 = tpu.concatenate %45, %55, %65, %75 in 1 : vector<8x32xf32>, vector<8x32xf32>, vector<8x32xf32>, vector<8x32xf32> -> vector<8x128xf32>
    %77 = arith.mulf %76, %26 : vector<8x128xf32>
    %78 = arith.truncf %77 : vector<8x128xf32> to vector<8x128xbf16>
    %c0_34 = arith.constant 0 : index
    %c0_35 = arith.constant 0 : index
    %79 = vector.load %arg11[%c0_34, %c0_35] : memref<128x128xbf16, #tpu.memory_space<vmem>>, vector<128x128xbf16>
    %cst_36 = arith.constant dense<0.000000e+00> : vector<8x128xf32>
    %80 = tpu.matmul %78, %79, %cst_36 {dimension_numbers = #tpu.dot_dimension_numbers<[1], [0], [0], [1], [0, 0, 1, 1], [], []>} : vector<8x128xbf16>, vector<128x128xbf16>, vector<8x128xf32> -> vector<8x128xf32>
    %c0_37 = arith.constant 0 : index
    %c0_38 = arith.constant 0 : index
    %81 = vector.load %arg12[%c0_37, %c0_38] : memref<1x128xf32, #tpu.memory_space<vmem>>, vector<1x128xf32>
    %82 = vector.broadcast %81 : vector<1x128xf32> to vector<8x128xf32>
    %83 = arith.addf %80, %82 : vector<8x128xf32>
    %84 = arith.addf %83, %77 : vector<8x128xf32>
    %c0_39 = arith.constant 0 : index
    %c0_40 = arith.constant 0 : index
    %85 = vector.load %arg13[%c0_39, %c0_40] : memref<8x128xf32, #tpu.memory_space<vmem>>, vector<8x128xf32>
    tpu.vector_store %arg13[%c0_39, %c0_40], %84 {strides = array<i32>} : memref<8x128xf32, #tpu.memory_space<vmem>>, vector<8x128xf32>,
    return
  }
  func.func @transform_0(%arg0: i32) -> (i32, i32) {
    %c0_i32 = arith.constant 0 : i32
    %c0_i32_0 = arith.constant 0 : i32
    return %arg0, %c0_i32 : i32, i32
  }
  func.func @transform_1(%arg0: i32) -> (i32, i32) {
    %c0_i32 = arith.constant 0 : i32
    %c0_i32_0 = arith.constant 0 : i32
    return %arg0, %c0_i32 : i32, i32
  }
  func.func @transform_2(%arg0: i32) -> (i32, i32) {
    %c0_i32 = arith.constant 0 : i32
    %c0_i32_0 = arith.constant 0 : i32
    return %arg0, %c0_i32 : i32, i32
  }
  func.func @transform_3(%arg0: i32) -> (i32, i32) {
    %c0_i32 = arith.constant 0 : i32
    %c0_i32_0 = arith.constant 0 : i32
    %c0_i32_1 = arith.constant 0 : i32
    return %c0_i32, %c0_i32_0 : i32, i32
  }
  func.func @transform_4(%arg0: i32) -> (i32, i32) {
    %c0_i32 = arith.constant 0 : i32
    %c0_i32_0 = arith.constant 0 : i32
    %c0_i32_1 = arith.constant 0 : i32
    return %c0_i32, %c0_i32_0 : i32, i32
  }
  func.func @transform_5(%arg0: i32) -> (i32, i32) {
    %c0_i32 = arith.constant 0 : i32
    %c0_i32_0 = arith.constant 0 : i32
    %c0_i32_1 = arith.constant 0 : i32
    return %c0_i32, %c0_i32_0 : i32, i32
  }
  func.func @transform_6(%arg0: i32) -> (i32, i32) {
    %c0_i32 = arith.constant 0 : i32
    %c0_i32_0 = arith.constant 0 : i32
    %c0_i32_1 = arith.constant 0 : i32
    return %c0_i32, %c0_i32_0 : i32, i32
  }
  func.func @transform_7(%arg0: i32) -> (i32, i32) {
    %c0_i32 = arith.constant 0 : i32
    %c0_i32_0 = arith.constant 0 : i32
    %c0_i32_1 = arith.constant 0 : i32
    return %c0_i32, %c0_i32_0 : i32, i32
  }
  func.func @transform_8(%arg0: i32) -> (i32, i32) {
    %c0_i32 = arith.constant 0 : i32
    %c0_i32_0 = arith.constant 0 : i32
    %c0_i32_1 = arith.constant 0 : i32
    return %c0_i32, %c0_i32_0 : i32, i32
  }
  func.func @transform_9(%arg0: i32) -> (i32, i32) {
    %c0_i32 = arith.constant 0 : i32
    %c0_i32_0 = arith.constant 0 : i32
    %c0_i32_1 = arith.constant 0 : i32
    return %c0_i32, %c0_i32_0 : i32, i32
  }
  func.func @transform_10(%arg0: i32) -> (i32, i32) {
    %c0_i32 = arith.constant 0 : i32
    %c0_i32_0 = arith.constant 0 : i32
    %c0_i32_1 = arith.constant 0 : i32
    return %c0_i32, %c0_i32_0 : i32, i32
  }
  func.func @transform_11(%arg0: i32) -> (i32, i32) {
    %c0_i32 = arith.constant 0 : i32
    %c0_i32_0 = arith.constant 0 : i32
    %c0_i32_1 = arith.constant 0 : i32
    return %c0_i32, %c0_i32_0 : i32, i32
  }
  func.func @transform_12(%arg0: i32) -> (i32, i32) {
    %c0_i32 = arith.constant 0 : i32
    %c0_i32_0 = arith.constant 0 : i32
    return %arg0, %c0_i32 : i32, i32
  }
}

</mosaic_0001>

<bundles_post_ra>
// kernel: tpu_custom_call.1
= control target key start
LH: loop header
LB: loop body
LE: loop exit
PB: predicated region body
PF: predicated region fallthrough
CT: control target
= control target key end

     0   :  { %s2353_s0 = inlined_call_operand.vmem [shape: s32[16,4], index: 0, kind: input, shape index: {}]   ;;  %s2354_s1 = inlined_call_operand.vmem [shape: f32[16,4], index: 1, kind: input, shape index: {}]   ;;  %s2355_s2 = inlined_call_operand.hbm [shape: f32[16,64], index: 2, kind: input, shape index: {}]   ;;  %s2356_s3 = inlined_call_operand.vmem [shape: bf16[16,32], index: 3, kind: input, shape index: {}]   ;;  %s2357_s4 = inlined_call_operand.vmem [shape: bf16[64,128], index: 4, kind: input, shape index: {}]   ;;  %s2358_s5 = inlined_call_operand.vmem [shape: f32[1,128], index: 5, kind: input, shape index: {}]   ;;  %s2359_s6 = inlined_call_operand.hbm [shape: bf16[128,128], index: 6, kind: input, shape index: {}]   ;;  %s2360_s7 = inlined_call_operand.vmem [shape: f32[1,128], index: 7, kind: input, shape index: {}]   ;;  %s2361_s8 = inlined_call_operand.hbm [shape: bf16[128,128], index: 8, kind: input, shape index: {}]   ;;  %s2362_s9 = inlined_call_operand.vmem [shape: f32[1,128], index: 9, kind: input, shape index: {}]   ;;  %s2363_s10 = inlined_call_operand.hbm [shape: bf16[128,128], index: 10, kind: input, shape index: {}]   ;;  %s2364_s11 = inlined_call_operand.vmem [shape: f32[1,128], index: 11, kind: input, shape index: {}]   ;;  %s2365_s12 = inlined_call_operand.hbm [shape: f32[16,128], index: 12, kind: output, shape index: {}]  }
   0x1   :  { %2374 = sst [smem:[#allocation19_spill]] %s2359_s6 }
   0x2   :  { %2375 = sst [smem:[#allocation20_spill]] %s2361_s8 }
   0x3   :  { %2376 = sst [smem:[#allocation21_spill]] %s2363_s10 }
   0x4   :  { %17 = vsyncpa [#allocation3], 0 }
   0x5   :  { %19 = vsyncpa [#allocation3 + $0x1], 0 }
   0x6   :  { %20 = vsyncpa [#allocation6], 0 }
   0x7   :  { %21 = vsyncpa [#allocation9], 0 }
   0x8   :  { %22 = vsyncpa [#allocation4], 0 }
   0x9   :  { %24 = vsyncpa [#allocation4 + $0x1], 0  ;;  %s2024_s21 = smov 0   ;;  %s2026_s22 = smov 0  }
   0xa   :  { %s2028_s23 = smov 0   ;;  %s2030_s24 = smov 0  }
   0xb LB: > { %2377 = sst [smem:[#allocation15_spill]] %s1931_s23  ;;  %s2045_s25 = sadd.s32 4294967295, %s1935_s24   ;;  %s1935_s24 = sphi %s2030_s24, %s2401_s24   ;;  %s1931_s23 = sphi %s2028_s23, %s2403_s23   ;;  %s1927_s22 = sphi %s2026_s22, %s2405_s22   ;;  %s1923_s21 = sphi %s2024_s21, %s2404_s21  }
   0xc   : > { %s1422_s26 = sadd.s32 4294967294, %s1935_s24   ;;  %p102_p0 = scmp.ne.s32.totalorder %s1927_s22, %s1923_s21 }
   0xd   : > { %p2366_p1 = scmp.eq.s32.totalorder %s2045_s25, 0  ;;  %p321_p3 = scmp.eq.s32.totalorder %s1422_s26, 1 }
   0xe   : > { %p1423_p5 = scmp.ge.s32.totalorder %s1935_s24, 1  ;;  %p328_p7 = scmp.lt.s32.totalorder %s1935_s24, 3 }
   0xf   : > { %p2054_p4 = por %p2366_p1, %p102_p0  ;;  %p2059_p6 = por %p321_p3, %p102_p0 }
  0x10   : > { %p2064_p8 = pnand %p1423_p5, %p328_p7  ;;  %s1937_s30 = smov [#allocation5]  }
  0x11   : > { %s2378_s27 = scalar_select %p2054_p4, 1, 0 }
  0x12   : > { %s2379_s28 = scalar_select %p2059_p6, 1, 0 }
  0x13   : > { %s2381_s29 = scalar_select %p2064_p8, 1, 0 }
  0x14   : > { %2380 = sst [smem:[#allocation16_spill]] %s2379_s28  ;;  %s349_s13 = sshll.u32 %s1937_s30, 4  ;;  %s350_s13 = int_to_ptr.vmem [resolvable:$true] %s349_s13 }
  0x15   : > { %p1640_p9 = pneg %p2064_p8  ;;  %s1938_s15 = smov [#allocation7]  }
  0x16   : > { %s365_s16 = sshll.u32 %s1938_s15, 4  ;;  %s1939_s17 = smov [#allocation8]   ;;  %s366_s16 = int_to_ptr.vmem [resolvable:$true] %s365_s16 }
  0x17   : > { %p2073_p11 = pnand %p1640_p9, %p2366_p1  ;;  %s381_s18 = sshll.u32 %s1939_s17, 4  ;;  %s382_s18 = int_to_ptr.vmem [resolvable:$true] %s381_s18 }
  0x18   : > { %s1768_s19 = scalar_lea.vmem %s350_s13, 1024  ;;  %p1776_p5 = scmp.lt.s32.totalorder %s350_s13, %s350_s13 }
  0x19   : > { %p1759_p12 = pneg %p2073_p11  ;;  %p1769_p13 = scmp.ne.s32.totalorder %s350_s13, %s1768_s19 }
  0x1a   : > { %p1777_p7 = scmp.lt.s32.totalorder %s1768_s19, %s1768_s19 }
  0x1b   : > { %p1771_p0 = pnand %p1769_p13, %p1759_p12 }
  0x1c   : > { %p1778_p9 = por %p1777_p7, %p1776_p5 }
  0x1d   : > { %p1772_p3 = pneg %p1771_p0 }
  0x1f   : > { %p1779_p10 = pnand %p1778_p9, %p1772_p3 }
  0x21   : > { %1782 = shalt.err (!%p1779_p10)
}
  0x22   : > { %s1940_s20 = smov 64   ;;  %s1941_s26 = smov 4  }
  0x23   : > { %s2383_s6 = sld [smem:[#allocation19_spill]]  ;;  %s1794_s17 = scalar_lea.vmem %s366_s16, 1024 }
  0x24   : > { %p1795_p1 = scmp.ne.s32.totalorder %s366_s16, %s1794_s17  ;;  %p1802_p2 = scmp.lt.s32.totalorder %s366_s16, %s366_s16 }
  0x25   : > { %p1803_p6 = scmp.lt.s32.totalorder %s1794_s17, %s1794_s17 }
  0x26   : > { %p1797_p13 = pnand %p1795_p1, %p1759_p12 }
  0x27   : > { %p1804_p5 = por %p1803_p6, %p1802_p2 }
  0x28   : > { %p1798_p0 = pneg %p1797_p13 }
  0x29   : > { %1643 = dma.hbm_to_vmem [thread:$0]  (!%p2073_p11), %s2383_s6, 1024, %s350_s13, [#allocation6], %s1940_s20, %s1940_s20, %s1941_s26  }
  0x2a   : > { %p1805_p3 = pnand %p1804_p5, %p1798_p0 }
  0x2c   : > { %1808 = shalt.err (!%p1805_p3)
}
  0x2d   : > { %s2384_s8 = sld [smem:[#allocation20_spill]]  ;;  %s1820_s13 = scalar_lea.vmem %s382_s18, 1024 }
  0x2e   : > { %p1821_p10 = scmp.ne.s32.totalorder %s382_s18, %s1820_s13  ;;  %p1828_p9 = scmp.lt.s32.totalorder %s382_s18, %s382_s18 }
  0x2f   : > { %p1829_p13 = scmp.lt.s32.totalorder %s1820_s13, %s1820_s13 }
  0x30   : > { %p1823_p7 = pnand %p1821_p10, %p1759_p12 }
  0x31   : > { %p1830_p4 = por %p1829_p13, %p1828_p9 }
  0x32   : > { %p1824_p1 = pneg %p1823_p7 }
  0x33   : > { %1646 = dma.hbm_to_vmem [thread:$0]  (!%p2073_p11), %s2384_s8, 1024, %s366_s16, [#allocation6], %s1940_s20, %s1940_s20, %s1941_s26  }
  0x34   : > { %p1831_p2 = pnand %p1830_p4, %p1824_p1 }
  0x36   : > { %1834 = shalt.err (!%p1831_p2)
}
  0x37   : > { %s2385_s10 = sld [smem:[#allocation21_spill]]  ;;  %s2104_s28 = sadd.s32 1, %s1935_s24  }
  0x38   : > { %2386 = sst [smem:[#allocation17_spill]] %s2104_s28  ;;  %s86_s16 = ssub.s32 %s1935_s24, %s2104_s28 }
  0x39   : > { %s89_s14 = sadd.s32 1, %s1931_s23  ;;  %p87_p4 = scmp.eq.s32.totalorder %s86_s16, 0 }
  0x3a   : > { %p96_p6 = scmp.ne.s32.totalorder %s1931_s23, %s1927_s22  ;;  %p97_p12 = scmp.eq.s32.totalorder %s1935_s24, 0 }
  0x3b   : > { %p1661_p0 = scmp.lt.s32.totalorder %s1935_s24, 2  ;;  %p2388_p3 = scmp.eq.s32.totalorder %s2045_s25, 1 }
  0x3c   : > { %s2114_s17 = scalar_select %p87_p4, %s1931_s23, %s89_s14  }
  0x3d   : > { %1649 = dma.hbm_to_vmem [thread:$0]  (!%p2073_p11), %s2385_s10, 1024, %s382_s18, [#allocation9], %s1940_s20, %s1940_s20, %s1941_s26  }
  0x3e   : > { %2387 = sst [smem:[#allocation18_spill]] %s2114_s17  ;;  %p98_p5 = por %p97_p12, %p96_p6 }
  0x3f   : > { %p2118_p10 = por %p2388_p3, %p96_p6  ;;  %s412_s13 = sand.u32 1, %s1931_s23  }
  0x40   : > { %s1429_s30 = sshll.u32 %s1935_s24, 7  ;;  %s1428_s18 = sshll.u32 %s412_s13, 3 }
  0x41   : > { %s2389_s19 = scalar_select %p2118_p10, 1, 0 }
  0x42   : > { %s2127_s15 = scalar_lea.hbm %s2355_s2, %s1429_s30  ;;  %s416_s16 = scalar_lea.vmem [#allocation2], %s1428_s18 }
  0x43   : > { %s423_s14 = sshll.u32 %s416_s16, 4  ;;  %p2129_p11 = pnand %p1661_p0, %p98_p5  ;;  %s424_s14 = int_to_ptr.vmem [resolvable:$true] %s423_s14 }
  0x44   : > { %s413_s8 = scalar_lea.sflag [#allocation3], %s412_s13  ;;  %s1835_s10 = scalar_lea.hbm %s2127_s15, 128 }
  0x45   : > { %p1836_p7 = scmp.ne.s32.totalorder %s2127_s15, %s1835_s10  ;;  %p1837_p1 = pneg %p2129_p11 }
  0x46   : > { %s1840_s26 = scalar_lea.hbm %s2355_s2, 256  ;;  %p1841_p2 = scmp.lt.s32.totalorder %s2127_s15, %s2355_s2 }
  0x47   : > { %p1838_p9 = pnand %p1837_p1, %p1836_p7  ;;  %p1842_p4 = scmp.lt.s32.totalorder %s1840_s26, %s1835_s10 }
  0x49   : > { %p1839_p13 = pneg %p1838_p9  ;;  %p1843_p6 = por %p1842_p4, %p1841_p2 }
  0x4b   : > { %p1844_p12 = pnand %p1843_p6, %p1839_p13 }
  0x4d   : > { %1847 = shalt.err (!%p1844_p12)
}
  0x4e   : > { %s1848_s16 = scalar_lea.vmem %s424_s14, 128  ;;  %s1942_s13 = smov [#allocation2]  }
  0x4f   : > { %p1849_p0 = scmp.ne.s32.totalorder %s424_s14, %s1848_s16  ;;  %s1853_s23 = sshll.u32 %s1942_s13, 4  ;;  %s1854_s23 = int_to_ptr.vmem [resolvable:$false] %s1853_s23 }
  0x50   : > { %s1855_s28 = scalar_lea.vmem %s1854_s23, 256  ;;  %p1856_p7 = scmp.lt.s32.totalorder %s424_s14, %s1854_s23 }
  0x51   : > { %p1851_p5 = pnand %p1849_p0, %p1837_p1  ;;  %p1857_p9 = scmp.lt.s32.totalorder %s1855_s28, %s1848_s16 }
  0x53   : > { %p1852_p3 = pneg %p1851_p5  ;;  %p1858_p10 = por %p1857_p9, %p1856_p7 }
  0x55   : > { %p1859_p8 = pnand %p1858_p10, %p1852_p3 }
  0x57   : > { %1862 = shalt.err (!%p1859_p8)
}
  0x58   : > { %1653 = dma.hbm_to_vmem [thread:$0]  (!%p2129_p11), %s2127_s15, 128, %s424_s14, %s413_s8  }
  0x59   : > { %p2391_p13 = scmp.ne.s32.totalorder %s2381_s29, 0 }
  0x5a   : > { %s2150_s10 = sand.u32 (!%p2391_p13), 1, %s1927_s22   ;;  %p2392_p8 = scmp.ne.s32.totalorder (!%p2391_p13), %s2378_s27, 0 }
  0x5b   : > { %432 = sbr.rel (%p2391_p13) target bundleno = 1057 (0x421), region = 68  ;;  %s1431_s17 = sshll.u32 (!%p2391_p13), %s2150_s10, 3 }
  0x5c   : > { %s435_s23 = scalar_lea.sflag (!%p2391_p13), [#allocation3], %s2150_s10  ;;  %s2156_s28 = scalar_lea.vmem (!%p2391_p13), [#allocation2], %s1431_s17 }
  0x60   : > { %1906 = dma.done.wait (%p2392_p8), %s435_s23, 128  }
  0x61   : > { %1908 = vsyncadd (%p2392_p8), %s435_s23, 4294967168  ;;  %p2393_p10 = scmp.eq.s32.totalorder %s2045_s25, 0 }
  0x63   : > { %1910 = dma.done.wait (%p2393_p10), [#allocation6], 2048   ;;  %p2394_p11 = pmov %p2393_p10 }
  0x64   : > { %p2395_p1 = pmov %p2393_p10 }
  0x65   : > { %1912 = vsyncadd (%p2394_p11), [#allocation6], 4294965248 }
  0x66   : > { %1914 = dma.done.wait (%p2395_p1), [#allocation9], 1024   ;;  %p2396_p2 = pmov %p2395_p1 }
  0x67   : > { %v1943_v0 = vmov 0.0   ;;  %vm1944_vm0 = vmmov 0   ;;  %p499_p4 = scmp.lt.s32.totalorder %s2045_s25, 1  ;;  %v1945_v1 = vmov 0   ;;  %v1946_v2 = vmov 1   ;;  %v1724_v3 = vld [vmem:[%s2357_s4 + $0x18] sm:$0xff]  }
  0x68   : > { %1916 = vsyncadd (%p2396_p2), [#allocation9], 4294966272  ;;  %1524 = vmatprep.subr.bf16.mxu1 %v1943_v0  ;;  %1532 = vmatprep.mubr.msk.bf16.mxu1 %vm1944_vm0, %v1943_v0  ;;  %v1725_v4 = vld [vmem:[%s2357_s4 + $0x10] sm:$0xff]   ;;  %v1726_v8 = vld [vmem:[%s2357_s4 + $0x8] sm:$0xff]   ;;  %vm551_vm1 = vcmask 523264   ;;  %s1955_s26 = smov 32  }
  0x69   : > { %1718 = vset.pattern.permute.xlu0 %v1945_v1  ;;  %1719 = vset.pattern.permute.xlu1 %v1946_v2  ;;  %s500_s6 = scalar_select %p499_p4, %s2045_s25, 1  ;;  %v1727_v11 = vld [vmem:[%s2357_s4] sm:$0xff]   ;;  %v1728_v19 = vld [vmem:[#allocation5 + $0x38] sm:$0xff]   ;;  %v1947_v26 = vmov 2102212464   ;;  %v1730_v36 = vld [vmem:[#allocation5 + $0x28] sm:$0xff]  }
  0x6a   : > { %1556 = vmatprep.subr.bf16.mxu0 %v1943_v0  ;;  %1572 = vmatprep.mubr.msk.bf16.mxu0 %vm1944_vm0, %v1943_v0  ;;  %v510_v12 = vld [vmem:[%s2156_s28] sm:$0xff]  ;;  %v1948_v28 = vmov 920167782   ;;  %v1949_v30 = vmov 683565275   ;;  %v1731_v49 = vld [vmem:[#allocation5 + $0x20] sm:$0xff]  }
  0x6b   : > { %s1436_s8 = sshll.u32 %s500_s6, 3  ;;  %1525 = vmatpush3.bf16.msra.mxu1 %v1724_v3  ;;  %v511_v17 = vpack.c.bf16 %v510_v12, %v510_v12  ;;  %v1729_v22 = vld [vmem:[#allocation5 + $0x30] sm:$0xff]   ;;  %v1950_v32 = vmov 2475754826   ;;  %v1951_v34 = vmov 2131351028  }
  0x6c   : > { %s502_s30 = scalar_lea.vmem %s2353_s0, %s1436_s8  ;;  %s506_s18 = scalar_lea.vmem %s2354_s1, %s1436_s8  ;;  %1526 = vmatprep.subr.bf16.mxu1 %v1943_v0  ;;  %v1952_v38 = vmov 1326507024   ;;  %v1732_v3 = vld [vmem:[#allocation5 + $0x18] sm:$0xff]  }
  0x6d   : > { %v2191_v5 = vld [vmem:[%s502_s30] sm:$0xff]  ;;  %s1957_s16 = smov 64   ;;  %s1481_s27 = sshll.u32 %s2045_s25, 7 }
  0x6e   : > { %v509_v6 = vld [vmem:[%s506_s18] sm:$0xff]  ;;  %934 = vperm.xlu0 %1718, %v2191_v5   ;;  %995 = vperm.xlu1 %1719, %v2191_v5   ;;  %s1956_s18 = smov 96   ;;  %s498_s28 = scalar_lea.vmem [#allocation10], %s1431_s17 }
  0x6f   : > { %v2193_v7 = vmul.f32 0.62831855, %v509_v6  ;;  %1527 = vmatpush3.bf16.msra.mxu1 %v1725_v4  ;;  %s1299_s29 = sshll.u32 %s498_s28, 4  ;;  %s2310_s30 = scalar_lea.hbm %s2365_s12, %s1481_s27  ;;  %s2312_s29 = int_to_ptr.vmem [resolvable:$true] %s1299_s29 }
  0x70   : > { %1528 = vmatprep.subr.bf16.mxu1 %v1943_v0  ;;  %s1286_s25 = scalar_lea.sflag [#allocation4], %s2150_s10  ;;  %s1863_s20 = scalar_lea.vmem %s2312_s29, 128 }
  0x71   : > { %v827_v9 = vand.u32 2139095040, %v2193_v7  ;;  %v824_v10 = vand.u32 2147483647, %v2193_v7  ;;  %vm826_vm9 = vcmp.lt.s32.totalorder %v2193_v7, 0  ;;  %vm916_vm14 = vweird.f32 %v2193_v7  ;;  %p1864_p6 = scmp.ne.s32.totalorder %s2312_s29, %s1863_s20  ;;  %p2397_p12 = scmp.ne.s32.totalorder %s2389_s19, 0 }
  0x72   : > { %s1958_s17 = smov [#allocation10]  }
  0x73   : > { %v828_v13 = vshrl.u32 %v827_v9, 23  ;;  %v831_v14 = vand.u32 8388607, %v824_v10  ;;  %1529 = vmatpush3.bf16.msra.mxu1 %v1726_v8  ;;  %v1733_v9 = vld [vmem:[#allocation5 + $0x10] sm:$0xff]   ;;  %vm825_vm10 = vcmp.le.f32.partialorder %v824_v10, 0.7853982  ;;  %p1865_p0 = pnand %p1864_p6, %p2397_p12 }
  0x74   : > { %1530 = vmatprep.subr.bf16.mxu1 %v1943_v0  ;;  %v1735_v10 = vld [vmem:[#allocation5] sm:$0xff]  }
  0x75   : > { %v1462_v15 = vadd.s32 4294967169, %v828_v13  ;;  %v832_v16 = vor.u32 8388608, %v831_v14  ;;  %p1866_p5 = pneg %p1865_p0 }
  0x77   : > { %v834_v18 = vadd.s32 1, %v1462_v15  ;;  %1531 = vmatpush3.bf16.msra.mxu1 %v1727_v11  ;;  %v2211_v21 = vshll.u32 %v832_v16, 8 }
  0x78   : > { %1536 = vmatprep.subr.bf16.mxu1 %v1943_v0 }
  0x79   : > { %vm835_vm2 = vcmp.gt.s32.totalorder %v834_v18, 0 }
  0x7a   : > { %v836_v20 = vsel %vm835_vm2, %v834_v18, 0  ;;  %1533 = vmatmul.mubr.msk.bf16.vlgmr.msra.gmra.mxu1 %vm551_vm1, %v511_v17  ;;  %vm950_vm2 = vcmask 130048  }
  0x7b   : > { %v837_v23 = vshrl.u32 %v836_v20, 5  ;;  %v838_v24 = vand.u32 31, %v836_v20  ;;  %1537 = vmatpush3.bf16.msra.mxu1 %v1728_v19  ;;  %1552 = vmatprep.mubr.msk.bf16.mxu1 %vm1944_vm0, %v1943_v0 }
  0x7c   : > { %1538 = vmatprep.subr.bf16.mxu1 %v1943_v0 }
  0x7d   : > { %v839_v25 = vsub.s32 32, %v838_v24  ;;  %v850_v27 = vshll.u32 %v1947_v26, %v838_v24  ;;  %v853_v29 = vshll.u32 %v1948_v28, %v838_v24  ;;  %vm859_vm3 = vcmp.lt.s32.totalorder %v837_v23, 4 }
  0x7e   : > { %v841_v31 = vshll.u32 %v1949_v30, %v838_v24  ;;  %v844_v33 = vshll.u32 %v1950_v32, %v838_v24  ;;  %v847_v35 = vshll.u32 %v1951_v34, %v838_v24  ;;  %vm856_vm4 = vcmp.lt.s32.totalorder %v837_v23, 1 }
  0x7f   : > { %v851_v37 = vshrl.u32 %v1948_v28, %v839_v25  ;;  %v854_v39 = vshrl.u32 %v1952_v38, %v839_v25  ;;  %v840_v40 = vshrl.u32 %v1949_v30, %v839_v25  ;;  %v842_v41 = vshrl.u32 %v1950_v32, %v839_v25  ;;  %1539 = vmatpush3.bf16.msra.mxu1 %v1729_v22 }
  0x80   : > { %v845_v42 = vshrl.u32 %v1951_v34, %v839_v25  ;;  %v848_v43 = vshrl.u32 %v1947_v26, %v839_v25  ;;  %vm857_vm5 = vcmp.lt.s32.totalorder %v837_v23, 2  ;;  %vm858_vm6 = vcmp.lt.s32.totalorder %v837_v23, 3  ;;  %1540 = vmatprep.subr.bf16.mxu1 %v1943_v0 }
  0x81   : > { %v852_v44 = vor.u32 %v851_v37, %v850_v27  ;;  %v855_v45 = vor.u32 %v854_v39, %v853_v29  ;;  %v843_v46 = vor.u32 %v842_v41, %v841_v31 }
  0x82   : > { %v846_v47 = vor.u32 %v845_v42, %v844_v33  ;;  %v849_v48 = vor.u32 %v848_v43, %v847_v35 }
  0x83   : > { %v865_v50 = vsel %vm859_vm3, %v852_v44, 920167782  ;;  %v869_v51 = vsel %vm859_vm3, %v855_v45, 1326507024  ;;  %v860_v52 = vsel %vm856_vm4, %v840_v40, %v843_v46  ;;  %1541 = vmatpush3.bf16.msra.mxu1 %v1730_v36  ;;  %v1734_v40 = vld [vmem:[#allocation5 + $0x8] sm:$0xff]  }
  0x84   : > { %v861_v53 = vsel %vm859_vm3, %v849_v48, 2102212464  ;;  %v864_v54 = vsel %vm856_vm4, %v843_v46, %v846_v47  ;;  %v866_v55 = vsel %vm858_vm6, %v849_v48, %v865_v50  ;;  %v868_v56 = vsel %vm856_vm4, %v846_v47, %v849_v48  ;;  %1542 = vmatprep.subr.bf16.mxu1 %v1943_v0 }
  0x85   : > { %v862_v57 = vsel %vm858_vm6, %v846_v47, %v861_v53  ;;  %v867_v58 = vsel %vm857_vm5, %v864_v54, %v866_v55  ;;  %v870_v59 = vsel %vm858_vm6, %v852_v44, %v869_v51  ;;  %v1953_v51 = vmov 2   ;;  %v1738_v53 = vld [vmem:[#allocation7 + $0x30] sm:$0xff]   ;;  %v1739_v54 = vld [vmem:[#allocation7 + $0x28] sm:$0xff]   ;;  %v1740_v55 = vld [vmem:[#allocation7 + $0x20] sm:$0xff]  }
  0x86   : > { %v863_v60 = vsel %vm857_vm5, %v860_v52, %v862_v57  ;;  %v871_v61 = vsel %vm857_vm5, %v868_v56, %v870_v59  ;;  %v2232_v62 = vmul.u32.u64.low %v2211_v21, %v867_v58  ;;  %v2233_v63 = vmul.u32.u64.high %v2211_v21, %v867_v58, %v2232_v62  ;;  %v1741_v56 = vld [vmem:[#allocation7 + $0x18] sm:$0xff]   ;;  %v1438_v57 = vld [vmem:[%s2358_s5] ss:$0 sm:$0xff] }
  0x87   : > { %v2236_v1 = vmul.u32.u64.low %v2211_v21, %v871_v61  ;;  %v2237_v2 = vmul.u32.u64.high %v2211_v21, %v871_v61, %v2236_v1  ;;  %1543 = vmatpush3.bf16.msra.mxu1 %v1731_v49  ;;  %v879_v4 = vmul.u32 %v2211_v21, %v863_v60  ;;  %v1954_v52 = vmov 3  }
  0x88   : > { %1544 = vmatprep.subr.bf16.mxu1 %v1943_v0  ;;  %v882_v6 = vadd.s32 1, %v2233_v63  ;;  %v931_v58 = vlaneseq  ;;  %vm1168_vm6 = vcmask 785408  }
  0x89   : > { %vm881_vm7 = vc.u32 %v2237_v2, %v2232_v62  ;;  %v880_v20 = vadd.s32 %v2232_v62, %v2237_v2 }
  0x8a   : > { %v883_v8 = vsel %vm881_vm7, %v882_v6, %v2233_v63  ;;  %v932_v63 = vand.u32 127, %v931_v58  ;;  %v1736_v6 = vld [vmem:[%s2356_s3] sm:$0xff]  }
  0x8b   : > { %1545 = vmatpush3.bf16.msra.mxu1 %v1732_v3  ;;  %v884_v11 = vadd.s32 %v883_v8, %v879_v4 }
  0x8c   : > { %1546 = vmatprep.subr.bf16.mxu1 %v1943_v0 }
  0x8d   : > { %v885_v12 = vadd.s32 536870912, %v884_v11 }
  0x8f   : > { %1547 = vmatpush3.bf16.msra.mxu1 %v1733_v9  ;;  %v886_v13 = vshrl.u32 %v885_v12, 30 }
  0x90   : > { %1548 = vmatprep.subr.bf16.mxu1 %v1943_v0 }
  0x91   : > { %v887_v14 = vshll.u32 %v886_v13, 30  ;;  %v910_v35 = vsub.s32 4, %v886_v13 }
  0x93   : > { %v888_v15 = vsub.s32 %v884_v11, %v887_v14  ;;  %v911_v37 = vsel %vm826_vm9, %v910_v35, %v886_v13  ;;  %1549 = vmatpush3.bf16.msra.mxu1 %v1734_v40 }
  0x94   : > { %v913_v38 = vsel %vm825_vm10, 0, %v911_v37  ;;  %1550 = vmatprep.subr.bf16.mxu1 %v1943_v0 }
  0x95   : > { %v890_v16 = vsub.s32 0, %v888_v15  ;;  %v917_v39 = vand.u32 3, %v913_v38 }
  0x97   : > { %v1463_v17 = vmin.u32 %v890_v16, %v888_v15  ;;  %vm922_vm11 = vcmp.eq.s32.totalorder %v917_v39, 2  ;;  %vm919_vm12 = vcmp.eq.s32.totalorder %v917_v39, 0  ;;  %vm918_vm13 = vcmp.lt.s32.totalorder %v917_v39, 2  ;;  %1551 = vmatpush3.bf16.msra.mxu1 %v1735_v10 }
  0x98   : > { %1576 = vmatprep.subr.bf16.mxu1 %v1943_v0 }
  0x99   : > { %v892_v18 = vclz %v1463_v17  ;;  %v1743_v17 = vld [vmem:[#allocation7 + $0x8] sm:$0xff]  }
  0x9b   : > { %v1464_v19 = vadd.s32 4294967294, %v892_v18 }
  0x9d   : > { %vm1465_vm8 = vcmp.lt.s32.totalorder %v1464_v19, 0 }
  0x9e   : > { %v895_v21 = vsel %vm1465_vm8, 0, %v1464_v19 }
  0x9f   : > { %v896_v22 = vsub.s32 32, %v895_v21  ;;  %v897_v23 = vshll.u32 %v888_v15, %v895_v21  ;;  %v900_v24 = vsub.s32 4294967266, %v895_v21 }
  0xa1   : > { %v898_v25 = vshrl.u32 %v880_v20, %v896_v22  ;;  %v901_v26 = vadd.s32 127, %v900_v24  ;;  %v1744_v20 = vld [vmem:[#allocation7] sm:$0xff]  }
  0xa3   : > { %v899_v27 = vor.u32 %v898_v25, %v897_v23  ;;  %v902_v28 = vshll.u32 %v901_v26, 23  ;;  %v1444_v26 = vld [vmem:[%s2360_s7] ss:$0 sm:$0xff] }
  0xa5   : > { %v903_v29 = vor.u32 4788187, %v902_v28  ;;  %v906_v30 = vcvt.s32.f32 %v899_v27 }
  0xa7   : > { %v904_v31 = vand.u32 2147483647, %v903_v29 }
  0xa9   : > { %v907_v32 = vmul.f32 %v906_v30, %v904_v31 }
  0xab   : > { %v908_v33 = vxor.u32 2147483648, %v907_v32 }
  0xad   : > { %v909_v34 = vsel %vm826_vm9, %v908_v33, %v907_v32 }
  0xae   : > { %v912_v36 = vsel %vm825_vm10, %v2193_v7, %v909_v34  ;;  %v1737_v7 = vld [vmem:[#allocation7 + $0x38] sm:$0xff]  }
  0xaf   : > { %1753 = vcosq.f32 %v912_v36  ;;  %1557 = vmatpush3.bf16.msra.mxu0 %v1737_v7  ;;  %v1751_v7 = vld [vmem:[#allocation8 + $0x8] sm:$0xff]  }
  0xb0   : > { %1755 = vsinq.f32 %v912_v36  ;;  %1558 = vmatprep.subr.bf16.mxu0 %v1943_v0 }
  0xb3   : > { %1559 = vmatpush3.bf16.msra.mxu0 %v1738_v53  ;;  %v1752_v53 = vld [vmem:[#allocation8] sm:$0xff]  }
  0xb4   : > { %1560 = vmatprep.subr.bf16.mxu0 %v1943_v0 }
  0xb7   : > { %1561 = vmatpush3.bf16.msra.mxu0 %v1739_v54 }
  0xb8   : > { %1562 = vmatprep.subr.bf16.mxu0 %v1943_v0 }
  0xbb   : > { %1563 = vmatpush3.bf16.msra.mxu0 %v1740_v55 }
  0xbc   : > { %v1754_v41 = vpop.eup %1753  ;;  %1564 = vmatprep.subr.bf16.mxu0 %v1943_v0 }
  0xbd   : > { %v1756_v42 = vpop.eup %1755  ;;  %v923_v43 = vxor.u32 2147483648, %v1754_v41 }
  0xbe   : > { %v920_v44 = vxor.u32 2147483648, %v1756_v42 }
  0xbf   : > { %v924_v45 = vsel %vm922_vm11, %v923_v43, %v1756_v42  ;;  %1565 = vmatpush3.bf16.msra.mxu0 %v1741_v56 }
  0xc0   : > { %v921_v46 = vsel %vm919_vm12, %v1754_v41, %v920_v44  ;;  %1566 = vmatprep.subr.bf16.mxu0 %v1943_v0 }
  0xc1   : > { %v925_v47 = vsel %vm918_vm13, %v921_v46, %v924_v45 }
  0xc2   : > { %v926_v48 = vsel %vm916_vm14, nan, %v925_v47  ;;  %v1745_v47 = vld [vmem:[#allocation8 + $0x38] sm:$0xff]  }
  0xc3   : > { %v927_v49 = vadd.f32 1.0, %v926_v48  ;;  %v1746_v48 = vld [vmem:[#allocation8 + $0x30] sm:$0xff]  }
  0xc5   : > { %v928_v50 = vmul.f32 0.5, %v927_v49  ;;  %v1747_v49 = vld [vmem:[#allocation8 + $0x28] sm:$0xff]  }
  0xc7   : > { %939 = vperm.xlu0 %1718, %v928_v50   ;;  %999 = vperm.xlu1 %1719, %v928_v50  }
  0xcb   : > { %1721 = vset.pattern.permute.xlu1 %v1953_v51  ;;  %1720 = vset.pattern.permute.xlu0 %v1953_v51  ;;  %v1749_v51 = vld [vmem:[#allocation8 + $0x18] sm:$0xff]  }
  0xcc   : > { %1052 = vperm.xlu1 %1721, %v928_v50   ;;  %1048 = vperm.xlu0 %1720, %v2191_v5  }
  0xd0   : > { %1722 = vset.pattern.permute.xlu1 %v1954_v52  ;;  %1723 = vset.pattern.permute.xlu0 %v1954_v52  ;;  %v1750_v52 = vld [vmem:[#allocation8 + $0x10] sm:$0xff]  }
  0xd1   : > { %1101 = vperm.xlu1 %1722, %v2191_v5   ;;  %1105 = vperm.xlu0 %1723, %v928_v50   ;;  %v1742_v5 = vld [vmem:[#allocation7 + $0x10] sm:$0xff]   ;;  %v1748_v50 = vld [vmem:[#allocation8 + $0x20] sm:$0xff]  }
  0xd2   : > { %1567 = vmatpush3.bf16.msra.mxu0 %v1742_v5 }
  0xd3   : > { %1568 = vmatprep.subr.bf16.mxu0 %v1943_v0 }
  0xd6   : > { %1569 = vmatpush3.bf16.msra.mxu0 %v1743_v17 }
  0xd7   : > { %1570 = vmatprep.subr.bf16.mxu0 %v1943_v0 }
  0xda   : > { %1571 = vmatpush3.bf16.msra.mxu0 %v1744_v20 }
  0xdb   : > { %1588 = vmatprep.subr.bf16.mxu0 %v1943_v0 }
  0xe9   : > { %v935_v1 = vpop.permute.xlu0 %934  ;;  %v996_v11 = vpop.permute.xlu1 %995 }
  0xea   : > { %vm936_vm15 = vcmp.eq.s32.totalorder %v935_v1, %v932_v63  ;;  %vm997_vm3 = vcmp.eq.s32.totalorder %v996_v11, %v932_v63 }
 0x13a   : > { %v589_v59 = vpop.f32.mrf.mxu1 }
 0x13b   : > { %v590_v60 = vadd.f32 %v1438_v57, %v589_v59 }
 0x13c   : > { %v1534_v61 = vpop.f32.mrf.mxu1 }
 0x13d   : > { %v595_v62 = vmul.f32 0.015, %v590_v60 }
 0x13e   : > { %v592_v2 = vpop.f32.mrf.mxu1 }
 0x13f   : > { %v596_v3 = vmax.f32 %v590_v60, %v595_v62 }
 0x140   : > { %v1535_v4 = vpop.f32.mrf.mxu1 }
 0x141   : > { %v597_v8 = vpack.c.bf16 %v596_v3, %v596_v3 }
 0x142   : > { %v940_v9 = vpop.permute.xlu0 %939  ;;  %v1000_v14 = vpop.permute.xlu1 %999 }
 0x143   : > { %1553 = vmatmul.mubr.bf16.vlgmr.msra.gmra.mxu1 %v597_v8  ;;  %v942_v12 = vsel %vm936_vm15, %v940_v9, 0.0  ;;  %v1002_v15 = vsel %vm997_vm3, %v1000_v14, 0.0  ;;  %v1471_v9 = vld [vmem:[%s2364_s11] ss:$0 sm:$0xff] }
 0x144   : > { %1577 = vmatpush3.bf16.msra.mxu1 %v1736_v6  ;;  %1578 = vmatprep.mubr.msk.bf16.mxu1 %vm1944_vm0, %v1943_v0  ;;  %v943_v13 = vpack.c.bf16 %v942_v12, %v942_v12  ;;  %v1003_v16 = vpack.c.bf16 %v1002_v15, %v1002_v15 }
 0x145   : > { %1582 = vmatprep.subr.bf16.mxu1 %v1943_v0 }
 0x147   : > { %v1053_v18 = vpop.permute.xlu1 %1052  ;;  %v1049_v19 = vpop.permute.xlu0 %1048 }
 0x148   : > { %vm1050_vm4 = vcmp.eq.s32.totalorder %v1049_v19, %v932_v63 }
 0x149   : > { %v1055_v22 = vsel %vm1050_vm4, %v1053_v18, 0.0 }
 0x14a   : > { %v1056_v39 = vpack.c.bf16 %v1055_v22, %v1055_v22 }
 0x14b   : > { %1579 = vmatmul.mubr.msk.bf16.vlgmr.msra.gmra.mxu1 %vm950_vm2, %v943_v13 }
 0x14c   : > { %1583 = vmatpush3.bf16.msra.mxu1 %v1736_v6  ;;  %1584 = vmatprep.mubr.msk.bf16.mxu1 %vm1944_vm0, %v1943_v0  ;;  %v1102_v21 = vpop.permute.xlu1 %1101  ;;  %v1106_v23 = vpop.permute.xlu0 %1105 }
 0x14d   : > { %1594 = vmatprep.subr.bf16.mxu1 %v1943_v0  ;;  %vm1103_vm5 = vcmp.eq.s32.totalorder %v1102_v21, %v932_v63 }
 0x14e   : > { %v1108_v24 = vsel %vm1103_vm5, %v1106_v23, 0.0 }
 0x14f   : > { %v1109_v25 = vpack.c.bf16 %v1108_v24, %v1108_v24 }
 0x153   : > { %1585 = vmatmul.mubr.msk.bf16.vlgmr.msra.gmra.mxu1 %vm950_vm2, %v1003_v16 }
 0x154   : > { %1595 = vmatpush3.bf16.msra.mxu1 %v1736_v6  ;;  %1596 = vmatprep.mubr.msk.bf16.mxu1 %vm1944_vm0, %v1943_v0 }
 0x15b   : > { %1597 = vmatmul.mubr.msk.bf16.vlgmr.msra.gmra.mxu1 %vm950_vm2, %v1109_v25 }
 0x203   : > { %v703_v27 = vpop.f32.mrf.mxu1 }
 0x204   : > { %v704_v28 = vadd.f32 %v1444_v26, %v703_v27 }
 0x205   : > { %v1554_v29 = vpop.f32.mrf.mxu1 }
 0x206   : > { %v709_v30 = vmul.f32 0.015, %v704_v28 }
 0x207   : > { %v706_v31 = vpop.f32.mrf.mxu1 }
 0x208   : > { %v710_v32 = vmax.f32 %v704_v28, %v709_v30 }
 0x209   : > { %v1555_v33 = vpop.f32.mrf.mxu1 }
 0x20a   : > { %v711_v34 = vpack.c.bf16 %v710_v32, %v710_v32 }
 0x20b   : > { %v988_v35 = vpop.f32.mrf.mxu1 }
 0x20c   : > { %1573 = vmatmul.mubr.bf16.vlgmr.msra.gmra.mxu0 %v711_v34 }
 0x20d   : > { %1589 = vmatpush3.bf16.msra.mxu0 %v1736_v6  ;;  %1590 = vmatprep.mubr.msk.bf16.mxu0 %vm1944_vm0, %v1943_v0  ;;  %v1580_v36 = vpop.f32.mrf.mxu1 }
 0x20e   : > { %1600 = vmatprep.subr.bf16.mxu0 %v1943_v0 }
 0x20f   : > { %v991_v37 = vpop.f32.mrf.mxu1 }
 0x211   : > { %v1581_v38 = vpop.f32.mrf.mxu1 }
 0x213   : > { %v1041_v40 = vpop.f32.mrf.mxu1 }
 0x214   : > { %1591 = vmatmul.mubr.msk.bf16.vlgmr.msra.gmra.mxu0 %vm950_vm2, %v1056_v39  ;;  %1154 = vrot.lane.b32.xlu1 %v1041_v40, %s1955_s26  ;;  %s1867_s26 = sshll.u32 %s1958_s17, 4  ;;  %s1868_s26 = int_to_ptr.vmem [resolvable:$false] %s1867_s26 }
 0x215   : > { %v1586_v41 = vpop.f32.mrf.mxu1  ;;  %1616 = vmatprep.mubr.msk.bf16.mxu0 %vm1944_vm0, %v1943_v0  ;;  %1601 = vmatpush3.bf16.msra.mxu0 %v1745_v47  ;;  %vm1165_vm0 = vcmask 261120   ;;  %p1870_p3 = scmp.lt.s32.totalorder %s2312_s29, %s1868_s26 }
 0x216   : > { %1602 = vmatprep.subr.bf16.mxu0 %v1943_v0 }
 0x217   : > { %v1044_v42 = vpop.f32.mrf.mxu1 }
 0x219   : > { %v1587_v43 = vpop.f32.mrf.mxu1  ;;  %1603 = vmatpush3.bf16.msra.mxu0 %v1746_v48 }
 0x21a   : > { %1604 = vmatprep.subr.bf16.mxu0 %v1943_v0 }
 0x21b   : > { %v1147_v10 = vpop.f32.mrf.mxu1 }
 0x21c   : > { %1162 = vrot.lane.b32.xlu0 %v1147_v10, %s1956_s18  ;;  %s1869_s18 = scalar_lea.vmem %s1868_s26, 256 }
 0x21d   : > { %v1598_v44 = vpop.f32.mrf.mxu1  ;;  %1605 = vmatpush3.bf16.msra.mxu0 %v1747_v49  ;;  %p1871_p7 = scmp.lt.s32.totalorder %s1869_s18, %s1863_s20 }
 0x21e   : > { %1606 = vmatprep.subr.bf16.mxu0 %v1943_v0 }
 0x21f   : > { %v1150_v45 = vpop.f32.mrf.mxu1  ;;  %p1872_p9 = por %p1871_p7, %p1870_p3 }
 0x221   : > { %v1599_v46 = vpop.f32.mrf.mxu1  ;;  %1607 = vmatpush3.bf16.msra.mxu0 %v1748_v50  ;;  %p1873_p13 = pnand %p1872_p9, %p1866_p5 }
 0x222   : > { %1608 = vmatprep.subr.bf16.mxu0 %v1943_v0 }
 0x225   : > { %1609 = vmatpush3.bf16.msra.mxu0 %v1749_v51 }
 0x226   : > { %1610 = vmatprep.subr.bf16.mxu0 %v1943_v0 }
 0x229   : > { %1611 = vmatpush3.bf16.msra.mxu0 %v1750_v52 }
 0x22a   : > { %1612 = vmatprep.subr.bf16.mxu0 %v1943_v0 }
 0x22d   : > { %1613 = vmatpush3.bf16.msra.mxu0 %v1751_v7 }
 0x22e   : > { %1614 = vmatprep.subr.bf16.mxu0 %v1943_v0  ;;  %v1453_v0 = vld [vmem:[%s2362_s9] ss:$0 sm:$0xff] }
 0x231   : > { %1615 = vmatpush3.bf16.msra.mxu0 %v1752_v53 }
 0x286   : > { %v1155_v61 = vpop.permute.xlu1 %1154 }
 0x287   : > { %v1166_v63 = vsel %vm1165_vm0, %v988_v35, %v1155_v61 }
 0x28e   : > { %v1163_v62 = vpop.permute.xlu0 %1162 }
 0x2cc   : > { %v817_v54 = vpop.f32.mrf.mxu0 }
 0x2cd   : > { %v818_v2 = vadd.f32 %v1453_v0, %v817_v54 }
 0x2ce   : > { %v1574_v55 = vpop.f32.mrf.mxu0 }
 0x2d0   : > { %v820_v56 = vpop.f32.mrf.mxu0 }
 0x2d2   : > { %v1575_v5 = vpop.f32.mrf.mxu0 }
 0x2d4   : > { %v1094_v57 = vpop.f32.mrf.mxu0 }
 0x2d5   : > { %1158 = vrot.lane.b32.xlu1 %v1094_v57, %s1957_s16 }
 0x2d6   : > { %v1592_v58 = vpop.f32.mrf.mxu0 }
 0x2d8   : > { %v1097_v59 = vpop.f32.mrf.mxu0 }
 0x2da   : > { %v1593_v60 = vpop.f32.mrf.mxu0 }
 0x347   : > { %v1159_v1 = vpop.permute.xlu1 %1158 }
 0x348   : > { %v1167_v3 = vsel %vm551_vm1, %v1166_v63, %v1159_v1 }
 0x349   : > { %v1169_v4 = vsel %vm1168_vm6, %v1167_v3, %v1163_v62 }
 0x34a   : > { %v1170_v6 = vmul.f32 %v1169_v4, %v818_v2 }
 0x34c   : > { %v1171_v8 = vpack.c.bf16 %v1170_v6, %v1170_v6 }
 0x34e   : > { %1617 = vmatmul.mubr.bf16.vlgmr.msra.gmra.mxu0 %v1171_v8 }
 0x40e   : > { %v1277_v11 = vpop.f32.mrf.mxu0 }
 0x40f   : > { %v1278_v12 = vadd.f32 %v1471_v9, %v1277_v11 }
 0x410   : > { %v1618_v13 = vpop.f32.mrf.mxu0 }
 0x411   : > { %v1283_v14 = vadd.f32 %v1278_v12, %v1170_v6 }
 0x412   : > { %v1280_v15 = vpop.f32.mrf.mxu0 }
 0x413   : > { %1284 = vst [vmem:[%s498_s28] sm:$0xff] %v1283_v14 }
 0x414   : > { %v1619_v16 = vpop.f32.mrf.mxu0 }
 0x415   : > { %1876 = shalt.err (!%p1873_p13)
}
 0x416   : > { %s1877_s16 = scalar_lea.hbm %s2310_s30, 128  ;;  %s1881_s23 = scalar_lea.hbm %s2365_s12, 256 }
 0x417   : > { %p1878_p8 = scmp.ne.s32.totalorder %s2310_s30, %s1877_s16  ;;  %p1882_p1 = scmp.lt.s32.totalorder %s2310_s30, %s2365_s12 }
 0x418   : > { %p1883_p2 = scmp.lt.s32.totalorder %s1881_s23, %s1877_s16 }
 0x419   : > { %p1879_p10 = pnand %p1878_p8, %p2397_p12 }
 0x41a   : > { %p1884_p4 = por %p1883_p2, %p1882_p1 }
 0x41b   : > { %p1880_p11 = pneg %p1879_p10 }
 0x41d   : > { %p1885_p6 = pnand %p1884_p4, %p1880_p11 }
 0x41f   : > { %1888 = shalt.err (!%p1885_p6)
}
 0x420   : > { %1638 = dma.vmem_to_hbm [thread:$0]  (%p2397_p12), %s2312_s29, 128, %s2310_s30, %s1286_s25  }
 0x421 PF: > { %s2398_s27 = sld [smem:[#allocation16_spill]]  ;;  %s1311_s28 = sand.u32 1, %s1923_s21  }
 0x422   : > { %p2400_p5 = scmp.ge.s32.totalorder %s1935_s24, 2  ;;  %s1312_s15 = scalar_lea.sflag [#allocation4], %s1311_s28 }
 0x427   : > { %p2399_p0 = scmp.ne.s32.totalorder %s2398_s27, 0 }
 0x429   : > { %p1655_p3 = pnand %p2400_p5, %p2399_p0 }
 0x42b   : > { %p1656_p7 = pneg %p1655_p3 }
 0x42d   : > { %1918 = dma.done.wait (%p1656_p7), %s1312_s15, 128  }
 0x42e   : > { %1920 = vsyncadd (%p1656_p7), %s1312_s15, 4294967168  ;;  %s2401_s24 = sld [smem:[#allocation17_spill]]  ;;  %s2404_s21 = smov %s1927_s22 }
 0x42f   : > { %s2402_s14 = sld [smem:[#allocation15_spill]] }
 0x430   : > { %s2403_s23 = sld [smem:[#allocation18_spill]] }
 0x434   : > { %p27_p9 = scmp.ge.s32.totalorder %s2401_s24, 4  }
 0x435   : > { %s2405_s22 = smov %s2402_s14 }
 0x436   :  { %29 = sbr.rel (!%p27_p9) target bundleno = 11 (0xb), region = 131 }
 0x43b   :  { %1317 = vsyncpa [#allocation3], 1 }
 0x43c   :  { %1319 = vsyncpa [#allocation3 + $0x1], 1 }
 0x43d   :  { %1320 = vsyncpa [#allocation6], 1 }
 0x43e   :  { %1321 = vsyncpa [#allocation9], 1 }
 0x43f   :  { %1322 = vsyncpa [#allocation4], 1 }
 0x440   :  { %1324 = vsyncpa [#allocation4 + $0x1], 1 }

</bundles_post_ra>
